<compile_context>
chip_gen: v7x
topology: tpu7x:2x2x1
jax: 0.10.0
libtpu: 0.0.40
codegen_flags: <defaults>
</compile_context>

<pallas_src>
import functools

import jax
import jax.numpy as jnp
from jax.experimental import pallas as pl
from jax.experimental.pallas import tpu as pltpu

EPS = 1e-6


def _round_up(x, m):
    return (x + m - 1) // m * m


def _vmem_cap_bytes():
    """Usable VMEM budget: 7/8 of physical, leaving headroom for compiler scratch.
    v7x: 64 MiB -> 56 MiB cap; v5e/v6e: 128 MiB -> 112 MiB cap."""
    try:
        phys = int(pltpu.get_tpu_info().vmem_capacity_bytes)
    except Exception:
        phys = 64 << 20  # conservative fallback = smallest current generation (v7x)
    return (phys * 7) // 8


def _center_scale(xf, approx_recip):
    """Torch-module LayerNorm pieces: (x - mean, 1/(unbiased_std + eps))."""
    h = xf.shape[-1]
    mean = jnp.mean(xf, axis=-1, keepdims=True)
    xc = xf - mean
    std = jnp.sqrt(jnp.sum(xc * xc, axis=-1, keepdims=True) / (h - 1))
    inv = pl.reciprocal(std + EPS, approx=approx_recip)  # per-row, EUP slot
    return xc, inv


def _fused_encoder_kernel(x_ref, w_ref, bias_ref, fa2_ref, fb2_ref, o_ref,
                          acc_ref, *, approx_recip):
    """One (row_tile, layer) grid step of the fused encoder.

    acc_ref: (TR, H) f32 VMEM scratch holding this row tile's running activations;
    it persists across the inner ("arbitrary") layer axis.
    """
    l = pl.program_id(1)
    n_layers = pl.num_programs(1)

    @pl.when(l == 0)
    def _init():
        acc_ref[...] = x_ref[...].astype(jnp.float32)

    # Pre-norm residual sublayer:  acc += ((acc - mean) * inv_std) @ W' + bias_eff
    # (a_2 folded into W', b_2 @ W + bias folded into bias_eff on the host).
    xc, inv = _center_scale(acc_ref[...], approx_recip)
    normed = (xc * inv).astype(w_ref.dtype)
    y = jnp.dot(normed, w_ref[...], preferred_element_type=jnp.float32)
    # Re-read the accumulator for the residual instead of keeping an f32 copy live
    # across the MXU op (avoids a (TR,H) f32 spill/reload).
    # TODO(synk): training-mode dropout (pltpu.prng_*) intentionally omitted (eval mode).
    acc_ref[...] = acc_ref[...] + y + bias_ref[...]

    @pl.when(l == n_layers - 1)
    def _finalize():
        zc, zinv = _center_scale(acc_ref[...], approx_recip)
        o_ref[...] = (fa2_ref[...] * (zc * zinv) + fb2_ref[...]).astype(o_ref.dtype)


def encoder_forward(x, layer_params, final_a2, final_b2, mask=None,
                    *, matmul_dtype=None, tile_rows=512):
    """Encoder.forward: N pre-norm residual Linear layers + final LayerNorm, fully fused.

    x: (B, S, H) activations (float32 or bfloat16; output keeps the same dtype).
    layer_params: list of (a_2, b_2, W, bias) with shapes (H,), (H,), (H, H), (H,).
    mask: accepted for API parity with Encoder.forward(x, mask); unused because the
          concrete sublayer here is a Linear, not attention.
    """
    del mask  # TODO(synk): mask is only meaningful for an attention sublayer.
    B, S, H = x.shape
    dtype = x.dtype
    n_layers = len(layer_params)
    assert n_layers >= 1, "need at least one encoder layer"
    if matmul_dtype is None:
        matmul_dtype = jnp.bfloat16 if dtype == jnp.bfloat16 else jnp.float32
    # Exact reciprocal on the f32 path keeps tight parity with the torch reference;
    # approx (EUP) reciprocal is free and well inside bf16 tolerance.
    approx_recip = (dtype == jnp.bfloat16)

    # Host-side folding:  LN(x)@W + bias == ((x-mean)*inv_std) @ (diag(a2)@W) + (b2@W + bias)
    w_list, b_list = [], []
    for a2, b2, w, bias in layer_params:
        a2f = a2.astype(jnp.float32).reshape(H)
        b2f = b2.astype(jnp.float32).reshape(H)
        wf = w.astype(jnp.float32)
        w_list.append((a2f[:, None] * wf).astype(matmul_dtype))
        b_list.append(b2f @ wf + bias.astype(jnp.float32).reshape(H))
    w_stack = jnp.stack(w_list)                               # (N, H, H) matmul dtype
    bias_stack = jnp.stack(b_list).reshape(n_layers, 1, H)    # (N, 1, H) f32
    fa2 = final_a2.astype(jnp.float32).reshape(1, H)
    fb2 = final_b2.astype(jnp.float32).reshape(1, H)

    R = B * S
    x2d = x.reshape(R, H)
    act_bytes = jnp.dtype(dtype).itemsize
    w_bytes = jnp.dtype(matmul_dtype).itemsize
    sub = 16 if act_bytes < 4 else 8                 # sublane packing of activation dtype
    cap = _vmem_cap_bytes()

    # At least 2 row tiles so the "parallel" row axis feeds both v7x TensorCores.
    tile_rows = _round_up(max(int(tile_rows), sub), sub)
    TR = max(sub, min(tile_rows, _round_up(pl.cdiv(R, 2), sub)))

    def vmem_need(tr):
        return (4 * tr * H * act_bytes               # x + out tiles, double-buffered
                + tr * H * 4                         # f32 activation accumulator scratch
                + 2 * H * H * w_bytes                # streamed layer weight, double-buffered
                + 2 * H * 4 * 3                      # bias_eff (2 bufs) + final a2/b2 (1 each)
                + (2 << 20))                         # compiler-internal scratch headroom

    while TR > sub and vmem_need(TR) > cap:          # shrink the row tile until it fits
        TR = max(sub, _round_up(TR // 2, sub))
    # TODO(synk): if H grows so large that the double-buffered (H,H) weight alone busts the
    # cap (bf16 H >~ 4k on v7x), add a K/N grid axis over W with pl.when init/finalize.

    Rp = _round_up(R, TR)
    xp = x2d if Rp == R else jnp.pad(x2d, ((0, Rp - R), (0, 0)))
    n_row_tiles = Rp // TR
    vmem_limit = int(min(max(vmem_need(TR), 32 << 20), cap))

    cost = pl.CostEstimate(
        flops=n_layers * (2 * R * H * H + 10 * R * H) + 8 * R * H,
        transcendentals=2 * (n_layers + 1) * R,                  # sqrt + recip per row per LN
        bytes_accessed=(2 * R * H * act_bytes                    # activations: one round trip
                        + n_row_tiles * n_layers * H * H * w_bytes
                        + n_layers * H * 4 + 2 * H * 4),
    )

    kernel = functools.partial(_fused_encoder_kernel, approx_recip=approx_recip)
    out = pl.pallas_call(
        kernel,
        out_shape=jax.ShapeDtypeStruct((Rp, H), dtype),
        grid_spec=pltpu.PrefetchScalarGridSpec(
            num_scalar_prefetch=0,
            grid=(n_row_tiles, n_layers),            # rows parallel (outer), layers arbitrary
            in_specs=[
                pl.BlockSpec((TR, H), lambda i, l: (i, 0)),           # x (consumed at l==0)
                pl.BlockSpec((None, H, H), lambda i, l: (l, 0, 0)),   # W'  streamed per layer
                pl.BlockSpec((None, 1, H), lambda i, l: (l, 0, 0)),   # bias_eff per layer
                pl.BlockSpec((1, H), lambda i, l: (0, 0),
                             pipeline_mode=pl.Buffered(1)),           # final a_2 (resident)
                pl.BlockSpec((1, H), lambda i, l: (0, 0),
                             pipeline_mode=pl.Buffered(1)),           # final b_2 (resident)
            ],
            out_specs=pl.BlockSpec((TR, H), lambda i, l: (i, 0)),
            scratch_shapes=[pltpu.VMEM((TR, H), jnp.float32)],
        ),
        compiler_params=pltpu.CompilerParams(
            dimension_semantics=("parallel", "arbitrary"),
            vmem_limit_bytes=vmem_limit),
        cost_estimate=cost,
    )(xp, w_stack, bias_stack, fa2, fb2)

    out = out if Rp == R else out[:R]
    return out.reshape(B, S, H)


def _reference_encoder(x, layer_params, final_a2, final_b2):
    """Pure-JAX f32 reference matching the torch semantics."""
    xf = x.astype(jnp.float32)
    h = xf.shape[-1]

    def ln(v, a2, b2):
        mean = jnp.mean(v, axis=-1, keepdims=True)
        xc = v - mean
        std = jnp.sqrt(jnp.sum(xc * xc, axis=-1, keepdims=True) / (h - 1))
        return a2 * xc / (std + EPS) + b2

    for a2, b2, w, bias in layer_params:
        xf = xf + (ln(xf, a2, b2) @ w.astype(jnp.float32) + bias)
    return ln(xf, final_a2, final_b2)


if __name__ == "__main__":
    B, S, H, N_LAYERS = 2, 8, 32, 2
    key = jax.random.PRNGKey(0)
    keys = jax.random.split(key, 1 + 4 * N_LAYERS + 2)
    x = jax.random.normal(keys[0], (B, S, H), dtype=jnp.float32)

    layer_params = []
    for l in range(N_LAYERS):
        a2 = 1.0 + 0.1 * jax.random.normal(keys[1 + 4 * l], (H,), dtype=jnp.float32)
        b2 = 0.05 * jax.random.normal(keys[2 + 4 * l], (H,), dtype=jnp.float32)
        w = jax.random.normal(keys[3 + 4 * l], (H, H), dtype=jnp.float32) / jnp.sqrt(H)
        bias = 0.01 * jax.random.normal(keys[4 + 4 * l], (H,), dtype=jnp.float32)
        layer_params.append((a2, b2, w, bias))
    final_a2 = 1.0 + 0.1 * jax.random.normal(keys[-2], (H,), dtype=jnp.float32)
    final_b2 = 0.05 * jax.random.normal(keys[-1], (H,), dtype=jnp.float32)

    # ---- f32 path (f32 MXU matmul, exact reciprocal; tight check vs reference) ----
    out = encoder_forward(x, layer_params, final_a2, final_b2, mask=None)
    out = jax.block_until_ready(out)
    ref = _reference_encoder(x, layer_params, final_a2, final_b2)
    assert out.shape == (B, S, H)
    assert out.dtype == jnp.float32
    assert jnp.allclose(out, ref, atol=5e-4, rtol=5e-4), "f32 path mismatch vs reference"

    # ---- bf16 activation path (bf16 MXU matmul, f32 accumulation, approx recip) ----
    x_bf = x.astype(jnp.bfloat16)
    out_bf = encoder_forward(x_bf, layer_params, final_a2, final_b2, mask=None)
    out_bf = jax.block_until_ready(out_bf)
    ref_bf = _reference_encoder(x_bf.astype(jnp.float32), layer_params, final_a2, final_b2)
    assert out_bf.shape == (B, S, H)
    assert out_bf.dtype == jnp.bfloat16
    assert jnp.allclose(out_bf.astype(jnp.float32), ref_bf, atol=1e-1, rtol=1e-1), \
        "bf16 path mismatch vs reference"

    print("KERNEL_OK")
</pallas_src>

<mosaic_0001>
module attributes {stable_mosaic.version = 11 : i64} {
  func.func @_fused_encoder_kernel(%arg0: i32, %arg1: i32, %arg2: memref<8x32xf32, #tpu.memory_space<vmem>>, %arg3: memref<1x32x32xf32, #tpu.memory_space<vmem>>, %arg4: memref<1x1x32xf32, #tpu.memory_space<vmem>>, %arg5: memref<1x32xf32, #tpu.memory_space<vmem>>, %arg6: memref<1x32xf32, #tpu.memory_space<vmem>>, %arg7: memref<8x32xf32, #tpu.memory_space<vmem>>, %arg8: memref<8x32xf32, #tpu.memory_space<vmem>>) attributes {dimension_semantics = [#tpu.dimension_semantics<parallel>, #tpu.dimension_semantics<arbitrary>], iteration_bounds = array<i64: 2, 2>, scalar_prefetch = 0 : i64, scratch_operands = 1 : i64, tpu.core_type = #tpu.core_type<tc>, window_params = [{transform_indices = @transform_0, window_bounds = array<i64: 8, 32>}, {transform_indices = @transform_1, window_bounds = array<i64: 1, 32, 32>}, {transform_indices = @transform_2, window_bounds = array<i64: 1, 1, 32>}, {pipeline_mode = #tpu.pipeline_mode<synchronous>, transform_indices = @transform_3, window_bounds = array<i64: 1, 32>}, {pipeline_mode = #tpu.pipeline_mode<synchronous>, transform_indices = @transform_4, window_bounds = array<i64: 1, 32>}, {transform_indices = @transform_5, window_bounds = array<i64: 8, 32>}]} {
    %c0_i32 = arith.constant 0 : i32
    %0 = arith.cmpi eq, %arg1, %c0_i32 : i32
    %1 = arith.extui %0 : i1 to i32
    %c0_i32_0 = arith.constant 0 : i32
    %2 = arith.cmpi ne, %1, %c0_i32_0 : i32
    scf.if %2 {
      %c0_18 = arith.constant 0 : index
      %c0_19 = arith.constant 0 : index
      %34 = vector.load %arg2[%c0_18, %c0_19] : memref<8x32xf32, #tpu.memory_space<vmem>>, vector<8x32xf32>
      %c0_20 = arith.constant 0 : index
      %c0_21 = arith.constant 0 : index
      %35 = vector.load %arg8[%c0_20, %c0_21] : memref<8x32xf32, #tpu.memory_space<vmem>>, vector<8x32xf32>
      tpu.vector_store %arg8[%c0_20, %c0_21], %34 {strides = array<i32>} : memref<8x32xf32, #tpu.memory_space<vmem>>, vector<8x32xf32>,
    } else {
    }
    %c0 = arith.constant 0 : index
    %c0_1 = arith.constant 0 : index
    %3 = vector.load %arg8[%c0, %c0_1] : memref<8x32xf32, #tpu.memory_space<vmem>>, vector<8x32xf32>
    %cst = arith.constant dense<0.000000e+00> : vector<8xf32>
    %4 = vector.multi_reduction <add>, %3, %cst [1] : vector<8x32xf32> to vector<8xf32>
    %5 = vector.shape_cast %4 : vector<8xf32> to vector<8x1xf32>
    %cst_2 = arith.constant 3.200000e+01 : f32
    %6 = vector.broadcast %cst_2 : f32 to vector<8x1xf32>
    %7 = arith.divf %5, %6 : vector<8x1xf32>
    %8 = vector.broadcast %7 : vector<8x1xf32> to vector<8x32xf32>
    %9 = arith.subf %3, %8 : vector<8x32xf32>
    %10 = arith.mulf %9, %9 : vector<8x32xf32>
    %cst_3 = arith.constant dense<0.000000e+00> : vector<8xf32>
    %11 = vector.multi_reduction <add>, %10, %cst_3 [1] : vector<8x32xf32> to vector<8xf32>
    %12 = vector.shape_cast %11 : vector<8xf32> to vector<8x1xf32>
    %cst_4 = arith.constant 3.100000e+01 : f32
    %13 = vector.broadcast %cst_4 : f32 to vector<8x1xf32>
    %14 = arith.divf %12, %13 : vector<8x1xf32>
    %15 = math.sqrt %14 : vector<8x1xf32>
    %cst_5 = arith.constant 9.99999997E-7 : f32
    %16 = vector.broadcast %cst_5 : f32 to vector<8x1xf32>
    %17 = arith.addf %15, %16 : vector<8x1xf32>
    %18 = tpu.reciprocal %17 : vector<8x1xf32> -> vector<8x1xf32>
    %19 = vector.broadcast %18 : vector<8x1xf32> to vector<8x32xf32>
    %20 = arith.mulf %9, %19 : vector<8x32xf32>
    %c0_6 = arith.constant 0 : index
    %c0_7 = arith.constant 0 : index
    %c0_8 = arith.constant 0 : index
    %21 = vector.load %arg3[%c0_6, %c0_7, %c0_8] : memref<1x32x32xf32, #tpu.memory_space<vmem>>, vector<1x32x32xf32>
    %22 = vector.shape_cast %21 : vector<1x32x32xf32> to vector<32x32xf32>
    %cst_9 = arith.constant dense<0.000000e+00> : vector<8x32xf32>
    %23 = tpu.matmul %20, %22, %cst_9 {dimension_numbers = #tpu.dot_dimension_numbers<[1], [0], [0], [1], [0, 0, 1, 1], [], []>} : vector<8x32xf32>, vector<32x32xf32>, vector<8x32xf32> -> vector<8x32xf32>
    %c0_10 = arith.constant 0 : index
    %c0_11 = arith.constant 0 : index
    %24 = vector.load %arg8[%c0_10, %c0_11] : memref<8x32xf32, #tpu.memory_space<vmem>>, vector<8x32xf32>
    %25 = arith.addf %24, %23 : vector<8x32xf32>
    %c0_12 = arith.constant 0 : index
    %c0_13 = arith.constant 0 : index
    %c0_14 = arith.constant 0 : index
    %26 = vector.load %arg4[%c0_12, %c0_13, %c0_14] : memref<1x1x32xf32, #tpu.memory_space<vmem>>, vector<1x1x32xf32>
    %27 = vector.shape_cast %26 : vector<1x1x32xf32> to vector<1x32xf32>
    %28 = vector.broadcast %27 : vector<1x32xf32> to vector<8x32xf32>
    %29 = arith.addf %25, %28 : vector<8x32xf32>
    %c0_15 = arith.constant 0 : index
    %c0_16 = arith.constant 0 : index
    %30 = vector.load %arg8[%c0_15, %c0_16] : memref<8x32xf32, #tpu.memory_space<vmem>>, vector<8x32xf32>
    tpu.vector_store %arg8[%c0_15, %c0_16], %29 {strides = array<i32>} : memref<8x32xf32, #tpu.memory_space<vmem>>, vector<8x32xf32>,
    %c1_i32 = arith.constant 1 : i32
    %31 = arith.cmpi eq, %arg1, %c1_i32 : i32
    %32 = arith.extui %31 : i1 to i32
    %c0_i32_17 = arith.constant 0 : i32
    %33 = arith.cmpi ne, %32, %c0_i32_17 : i32
    scf.if %33 {
      %c0_18 = arith.constant 0 : index
      %c0_19 = arith.constant 0 : index
      %34 = vector.load %arg8[%c0_18, %c0_19] : memref<8x32xf32, #tpu.memory_space<vmem>>, vector<8x32xf32>
      %cst_20 = arith.constant dense<0.000000e+00> : vector<8xf32>
      %35 = vector.multi_reduction <add>, %34, %cst_20 [1] : vector<8x32xf32> to vector<8xf32>
      %36 = vector.shape_cast %35 : vector<8xf32> to vector<8x1xf32>
      %cst_21 = arith.constant 3.200000e+01 : f32
      %37 = vector.broadcast %cst_21 : f32 to vector<8x1xf32>
      %38 = arith.divf %36, %37 : vector<8x1xf32>
      %39 = vector.broadcast %38 : vector<8x1xf32> to vector<8x32xf32>
      %40 = arith.subf %34, %39 : vector<8x32xf32>
      %41 = arith.mulf %40, %40 : vector<8x32xf32>
      %cst_22 = arith.constant dense<0.000000e+00> : vector<8xf32>
      %42 = vector.multi_reduction <add>, %41, %cst_22 [1] : vector<8x32xf32> to vector<8xf32>
      %43 = vector.shape_cast %42 : vector<8xf32> to vector<8x1xf32>
      %cst_23 = arith.constant 3.100000e+01 : f32
      %44 = vector.broadcast %cst_23 : f32 to vector<8x1xf32>
      %45 = arith.divf %43, %44 : vector<8x1xf32>
      %46 = math.sqrt %45 : vector<8x1xf32>
      %cst_24 = arith.constant 9.99999997E-7 : f32
      %47 = vector.broadcast %cst_24 : f32 to vector<8x1xf32>
      %48 = arith.addf %46, %47 : vector<8x1xf32>
      %49 = tpu.reciprocal %48 : vector<8x1xf32> -> vector<8x1xf32>
      %c0_25 = arith.constant 0 : index
      %c0_26 = arith.constant 0 : index
      %50 = vector.load %arg5[%c0_25, %c0_26] : memref<1x32xf32, #tpu.memory_space<vmem>>, vector<1x32xf32>
      %51 = vector.broadcast %49 : vector<8x1xf32> to vector<8x32xf32>
      %52 = arith.mulf %40, %51 : vector<8x32xf32>
      %53 = vector.broadcast %50 : vector<1x32xf32> to vector<8x32xf32>
      %54 = arith.mulf %53, %52 : vector<8x32xf32>
      %c0_27 = arith.constant 0 : index
      %c0_28 = arith.constant 0 : index
      %55 = vector.load %arg6[%c0_27, %c0_28] : memref<1x32xf32, #tpu.memory_space<vmem>>, vector<1x32xf32>
      %56 = vector.broadcast %55 : vector<1x32xf32> to vector<8x32xf32>
      %57 = arith.addf %54, %56 : vector<8x32xf32>
      %c0_29 = arith.constant 0 : index
      %c0_30 = arith.constant 0 : index
      %58 = vector.load %arg7[%c0_29, %c0_30] : memref<8x32xf32, #tpu.memory_space<vmem>>, vector<8x32xf32>
      tpu.vector_store %arg7[%c0_29, %c0_30], %57 {strides = array<i32>} : memref<8x32xf32, #tpu.memory_space<vmem>>, vector<8x32xf32>,
    } else {
    }
    return
  }
  func.func @transform_0(%arg0: i32, %arg1: i32) -> (i32, i32) {
    %c0_i32 = arith.constant 0 : i32
    %c0_i32_0 = arith.constant 0 : i32
    return %arg0, %c0_i32 : i32, i32
  }
  func.func @transform_1(%arg0: i32, %arg1: i32) -> (i32, i32, i32) {
    %c0_i32 = arith.constant 0 : i32
    %c0_i32_0 = arith.constant 0 : i32
    %c0_i32_1 = arith.constant 0 : i32
    return %arg1, %c0_i32, %c0_i32_0 : i32, i32, i32
  }
  func.func @transform_2(%arg0: i32, %arg1: i32) -> (i32, i32, i32) {
    %c0_i32 = arith.constant 0 : i32
    %c0_i32_0 = arith.constant 0 : i32
    %c0_i32_1 = arith.constant 0 : i32
    return %arg1, %c0_i32, %c0_i32_0 : i32, i32, i32
  }
  func.func @transform_3(%arg0: i32, %arg1: i32) -> (i32, i32) {
    %c0_i32 = arith.constant 0 : i32
    %c0_i32_0 = arith.constant 0 : i32
    %c0_i32_1 = arith.constant 0 : i32
    return %c0_i32, %c0_i32_0 : i32, i32
  }
  func.func @transform_4(%arg0: i32, %arg1: i32) -> (i32, i32) {
    %c0_i32 = arith.constant 0 : i32
    %c0_i32_0 = arith.constant 0 : i32
    %c0_i32_1 = arith.constant 0 : i32
    return %c0_i32, %c0_i32_0 : i32, i32
  }
  func.func @transform_5(%arg0: i32, %arg1: i32) -> (i32, i32) {
    %c0_i32 = arith.constant 0 : i32
    %c0_i32_0 = arith.constant 0 : i32
    return %arg0, %c0_i32 : i32, i32
  }
}

</mosaic_0001>

<bundles_post_ra>
// kernel: tpu_custom_call.1
= control target key start
LH: loop header
LB: loop body
LE: loop exit
PB: predicated region body
PF: predicated region fallthrough
CT: control target
= control target key end

     0   :  { %s1296_s0 = inlined_call_operand.hbm [shape: f32[16,32], index: 0, kind: input, shape index: {}]   ;;  %s1297_s1 = inlined_call_operand.hbm [shape: f32[2,32,32], index: 1, kind: input, shape index: {}]   ;;  %s1298_s2 = inlined_call_operand.vmem [shape: f32[2,1,32], index: 2, kind: input, shape index: {}]   ;;  %s1299_s3 = inlined_call_operand.vmem [shape: f32[1,32], index: 3, kind: input, shape index: {}]   ;;  %s1300_s4 = inlined_call_operand.vmem [shape: f32[1,32], index: 4, kind: input, shape index: {}]   ;;  %s1301_s5 = inlined_call_operand.hbm [shape: f32[16,32], index: 5, kind: output, shape index: {}]  }
   0x1   :  { %1312 = sst [smem:[#allocation18_spill]] %s1296_s0 }
   0x2   :  { %10 = vsyncpa [#allocation4], 0 }
   0x3   :  { %12 = vsyncpa [#allocation4 + $0x1], 0 }
   0x4   :  { %13 = vsyncpa [#allocation7], 0 }
   0x5   :  { %15 = vsyncpa [#allocation7 + $0x1], 0 }
   0x6   :  { %16 = vsyncpa [#allocation5], 0 }
   0x7   :  { %18 = vsyncpa [#allocation5 + $0x1], 0  ;;  %s985_s18 = smov 0   ;;  %s987_s19 = smov 0  }
   0x8   :  { %s989_s20 = smov 0   ;;  %s991_s21 = smov 0  }
   0x9   :  { %s993_s22 = smov 0   ;;  %s995_s23 = smov 0  }
   0xa   :  { %s997_s24 = smov 0   ;;  %s999_s25 = smov 0  }
   0xb   :  { %s1001_s26 = smov 0   ;;  %s1003_s27 = smov 0  }
   0xc   :  { %s1005_s28 = smov 0  }
   0xd LB: > { %1313 = sst [smem:[#allocation12_spill]] %s917_s21  ;;  %s593_s29 = sadd.s32 4294967295, %s945_s28   ;;  %s945_s28 = sphi %s1005_s28, %s1351_s28   ;;  %s941_s27 = sphi %s1003_s27, %s1350_s27   ;;  %s937_s26 = sphi %s1001_s26, %s1349_s26   ;;  %s933_s25 = sphi %s999_s25, %s1348_s25   ;;  %s929_s24 = sphi %s997_s24, %s1339_s24   ;;  %s925_s23 = sphi %s995_s23, %s1347_s23   ;;  %s921_s22 = sphi %s993_s22, %s1346_s22   ;;  %s917_s21 = sphi %s991_s21, %s1345_s21   ;;  %s913_s20 = sphi %s989_s20, %s1344_s20   ;;  %s909_s19 = sphi %s987_s19, %s1343_s19   ;;  %s905_s18 = sphi %s985_s18, %s1342_s18  }
   0xe   : > { %1314 = sst [smem:[#allocation13_spill]] %s937_s26  ;;  %s594_s30 = sadd.s32 4294967294, %s945_s28  }
   0xf   : > { %1315 = sst [smem:[#allocation14_spill]] %s945_s28  ;;  %p50_p0 = scmp.ne.s32.totalorder %s925_s23, %s921_s22 }
  0x10   : > { %p51_p1 = scmp.eq.s32.totalorder %s945_s28, 0  ;;  %p56_p2 = scmp.ne.s32.totalorder %s921_s22, %s917_s21 }
  0x11   : > { %p57_p3 = scmp.eq.s32.totalorder %s593_s29, 0  ;;  %p76_p5 = scmp.ne.s32.totalorder %s913_s20, %s909_s19 }
  0x12   : > { %p1047_p4 = por %p51_p1, %p50_p0  ;;  %p82_p7 = scmp.ne.s32.totalorder %s909_s19, %s905_s18 }
  0x13   : > { %p1053_p6 = por %p57_p3, %p56_p2  ;;  %p1058_p8 = por %p76_p5, %p51_p1 }
  0x14   : > { %p174_p9 = scmp.eq.s32.totalorder %s593_s29, 3  ;;  %p1062_p10 = por %p82_p7, %p57_p3 }
  0x15   : > { %s1317_s9 = scalar_select %p1053_p6, 1, 0 }
  0x16   : > { %s1319_s11 = scalar_select %p1062_p10, 1, 0 }
  0x17   : > { %p180_p11 = scmp.eq.s32.totalorder %s594_s30, 3  ;;  %p1066_p12 = por %p174_p9, %p50_p0 }
  0x18   : > { %p656_p1 = scmp.lt.s32.totalorder %s945_s28, 4  ;;  %s206_s14 = sand.u32 1, %s925_s23  }
  0x19   : > { %s1320_s12 = scalar_select %p1066_p12, 1, 0 }
  0x1a   : > { %p1070_p13 = por %p180_p11, %p56_p2  ;;  %s598_s15 = sshll.u32 %s941_s27, 7 }
  0x1b   : > { %s597_s16 = sshll.u32 %s206_s14, 3  ;;  %s1323_s0 = sld [smem:[#allocation18_spill]] }
  0x1c   : > { %s1321_s13 = scalar_select %p1070_p13, 1, 0 }
  0x1d   : > { %s210_s30 = scalar_lea.vmem [#allocation3], %s597_s16  ;;  %p1084_p0 = pnand %p656_p1, %p1047_p4 }
  0x1e   : > { %1322 = sst [smem:[#allocation15_spill]] %s1321_s13  ;;  %s217_s7 = sshll.u32 %s210_s30, 4  ;;  %s1088_s7 = int_to_ptr.vmem [resolvable:$true] %s217_s7 }
  0x1f   : > { %p1092_p2 = pnand %p656_p1, %p1058_p8  ;;  %p761_p7 = pneg %p1084_p0 }
  0x21   : > { %s1080_s29 = scalar_lea.hbm %s1323_s0, %s598_s15  ;;  %s207_s15 = scalar_lea.sflag [#allocation4], %s206_s14 }
  0x22   : > { %s759_s18 = scalar_lea.hbm %s1080_s29, 128  ;;  %s764_s30 = scalar_lea.hbm %s1323_s0, 256 }
  0x23   : > { %p760_p5 = scmp.ne.s32.totalorder %s1080_s29, %s759_s18  ;;  %p765_p8 = scmp.lt.u32.totalorder %s1080_s29, %s1323_s0 }
  0x24   : > { %p766_p11 = scmp.lt.u32.totalorder %s764_s30, %s759_s18  ;;  %p768_p3 = scmp.lt.u32.totalorder %s759_s18, %s1080_s29 }
  0x25   : > { %p762_p4 = pnand %p761_p7, %p760_p5 }
  0x26   : > { %p767_p1 = por %p766_p11, %p765_p8 }
  0x27   : > { %p763_p9 = pneg %p762_p4 }
  0x28   : > { %p769_p13 = por %p768_p3, %p767_p1 }
  0x2a   : > { %p770_p12 = pnand %p769_p13, %p763_p9 }
  0x2c   : > { %773 = shalt.err (!%p770_p12)
}
  0x2d   : > { %s774_s14 = scalar_lea.vmem %s1088_s7, 128  ;;  %s947_s8 = smov [#allocation3]  }
  0x2e   : > { %p775_p5 = scmp.ne.s32.totalorder %s1088_s7, %s774_s14  ;;  %s779_s16 = sshll.u32 %s947_s8, 4  ;;  %s780_s16 = int_to_ptr.vmem [resolvable:$false] %s779_s16 }
  0x2f   : > { %s781_s13 = scalar_lea.vmem %s780_s16, 256  ;;  %p782_p6 = scmp.lt.s32.totalorder %s1088_s7, %s780_s16 }
  0x30   : > { %p777_p4 = pnand %p775_p5, %p761_p7  ;;  %p783_p8 = scmp.lt.s32.totalorder %s781_s13, %s774_s14 }
  0x32   : > { %p778_p10 = pneg %p777_p4  ;;  %p784_p11 = por %p783_p8, %p782_p6 }
  0x34   : > { %p785_p3 = pnand %p784_p11, %p778_p10 }
  0x36   : > { %788 = shalt.err (!%p785_p3)
}
  0x37   : > { %648 = dma.hbm_to_vmem [thread:$0]  (!%p1084_p0), %s1080_s29, 128, %s1088_s7, %s207_s15  }
  0x38   : > { %p249_p12 = scmp.lt.s32.totalorder %s945_s28, 5  ;;  %s69_s18 = sadd.s32 1, %s913_s20 }
  0x39   : > { %p1326_p13 = scmp.ge.s32.totalorder %s945_s28, 1  ;;  %s33_s6 = sadd.s32 1, %s937_s26 }
  0x3a   : > { %s224_s10 = sand.u32 1, %s913_s20   ;;  %p34_p10 = scmp.ge.s32.totalorder %s33_s6, 2 }
  0x3b   : > { %p1126_p6 = pnand %p1326_p13, %p249_p12  ;;  %s599_s14 = sshll.u32 %s224_s10, 5 }
  0x3c   : > { %s616_s8 = sshll.u32 %s937_s26, 9  ;;  %s1353_s6 = smov (%p34_p10, %s33_s6), 0 }
  0x3d   : > { %1328 = sst [smem:[#allocation16_spill]] %s1353_s6  ;;  %s1329_s16 = sadd.s32 1, %s941_s27 }
  0x3e   : > { %s1355_s16 = smov (!%p34_p10, %s1329_s16), %s941_s27  ;;  %s66_s7 = ssub.s32 %s937_s26, %s1353_s6 }
  0x3f   : > { %p38_p0 = scmp.ge.s32.totalorder %s1355_s16, 2  ;;  %p67_p7 = scmp.eq.s32.totalorder %s66_s7, 0 }
  0x40   : > { %s1143_s13 = scalar_lea.hbm %s1297_s1, %s616_s8  ;;  %s228_s0 = scalar_lea.vmem [#allocation6], %s599_s14 }
  0x41   : > { %s235_s21 = sshll.u32 %s228_s0, 4  ;;  %s1357_s16 = smov (%p38_p0, %s1355_s16), 0  ;;  %s1152_s21 = int_to_ptr.vmem [resolvable:$true] %s235_s21 }
  0x42   : > { %1330 = sst [smem:[#allocation17_spill]] %s1357_s16  ;;  %s40_s6 = ssub.s32 %s941_s27, %s1357_s16 }
  0x43   : > { %s1148_s28 = scalar_select %p67_p7, %s913_s20, %s69_s18  }
  0x44   : > { %p41_p9 = scmp.eq.s32.totalorder %s40_s6, 0  ;;  %s1331_s7 = sadd.s32 1, %s925_s23 }
  0x45   : > { %s1159_s8 = scalar_lea.sflag [#allocation7], %s224_s10  ;;  %s789_s29 = scalar_lea.hbm %s1143_s13, 512 }
  0x46   : > { %s1157_s26 = scalar_select %p41_p9, %s925_s23, %s1331_s7  }
  0x47   : > { %p790_p1 = scmp.ne.s32.totalorder %s1143_s13, %s789_s29  ;;  %p791_p5 = pneg %p1092_p2 }
  0x48   : > { %s794_s14 = scalar_lea.hbm %s1297_s1, 1024  ;;  %p795_p11 = scmp.lt.u32.totalorder %s1143_s13, %s1297_s1 }
  0x49   : > { %p792_p4 = pnand %p791_p5, %p790_p1  ;;  %p796_p3 = scmp.lt.u32.totalorder %s794_s14, %s789_s29 }
  0x4a   : > { %p798_p13 = scmp.lt.u32.totalorder %s789_s29, %s1143_s13 }
  0x4b   : > { %p793_p8 = pneg %p792_p4  ;;  %p797_p12 = por %p796_p3, %p795_p11 }
  0x4d   : > { %p799_p10 = por %p798_p13, %p797_p12 }
  0x4f   : > { %p800_p0 = pnand %p799_p10, %p793_p8 }
  0x51   : > { %803 = shalt.err (!%p800_p0)
}
  0x52   : > { %s804_s6 = scalar_lea.vmem %s1152_s21, 512  ;;  %s948_s10 = smov [#allocation6]  }
  0x53   : > { %p805_p7 = scmp.ne.s32.totalorder %s1152_s21, %s804_s6  ;;  %s809_s7 = sshll.u32 %s948_s10, 4  ;;  %s810_s7 = int_to_ptr.vmem [resolvable:$false] %s809_s7 }
  0x54   : > { %s811_s16 = scalar_lea.vmem %s810_s7, 1024  ;;  %p812_p4 = scmp.lt.s32.totalorder %s1152_s21, %s810_s7 }
  0x55   : > { %p807_p9 = pnand %p805_p7, %p791_p5  ;;  %p813_p11 = scmp.lt.s32.totalorder %s811_s16, %s804_s6 }
  0x57   : > { %p808_p1 = pneg %p807_p9  ;;  %p814_p3 = por %p813_p11, %p812_p4 }
  0x59   : > { %p815_p12 = pnand %p814_p3, %p808_p1 }
  0x5b   : > { %818 = shalt.err (!%p815_p12)
}
  0x5c   : > { %s949_s29 = smov 128   ;;  %s950_s0 = smov 8  }
  0x5d   : > { %651 = dma.hbm_to_vmem [thread:$0]  (!%p1092_p2), %s1143_s13, 512, %s1152_s21, %s1159_s8, %s949_s29, %s949_s29, %s950_s0  }
  0x5e   : > { %253 = sbr.rel (%p1126_p6) target bundleno = 1020 (0x3fc), region = 40  ;;  %s1190_s18 = sand.u32 (!%p1126_p6), 1, %s921_s22  }
  0x5f   : > { %s603_s14 = sshll.u32 (!%p1126_p6), %s1190_s18, 3  ;;  %s256_s15 = scalar_lea.sflag (!%p1126_p6), [#allocation4], %s1190_s18 }
  0x60   : > { %s259_s6 = scalar_lea.vmem (!%p1126_p6), [#allocation3], %s603_s14  ;;  %p1332_p5 = scmp.ne.s32.totalorder (!%p1126_p6), %s1317_s9, 0 }
  0x65   : > { %892 = dma.done.wait (%p1332_p5), %s256_s15, 128  }
  0x66   : > { %894 = vsyncadd (%p1332_p5), %s256_s15, 4294967168  ;;  %s264_s21 = sand.u32 1, %s909_s19   ;;  %p1333_p2 = scmp.ne.s32.totalorder %s1319_s11, 0 }
  0x67   : > { %s604_s17 = sshll.u32 %s264_s21, 5  ;;  %s265_s30 = scalar_lea.sflag [#allocation7], %s264_s21 }
  0x68   : > { %s268_s13 = scalar_lea.vmem [#allocation6], %s604_s17 }
  0x69   : > { %896 = dma.done.wait (%p1333_p2), %s265_s30, 512  }
  0x6a   : > { %898 = vsyncadd (%p1333_p2), %s265_s30, 4294966784  ;;  %p303_p6 = scmp.lt.s32.totalorder %s929_s24, 1  ;;  %s1211_s16 = scalar_lea.vmem [#allocation8], %s603_s14 }
  0x6b   : > { %p606_p8 = scmp.ne.s32.totalorder %s929_s24, 0 }
  0x6c   : > { %s1205_s8 = scalar_select %p303_p6, %s929_s24, 1 }
  0x6d   : > { %309 = sbr.rel (%p606_p8) target bundleno = 116 (0x74), region = 52  ;;  %v310_v0 = vld [vmem:[%s259_s6] sm:$0xff] (!%p606_p8)  ;;  %vm311_vm0 = vcmask (!%p606_p8), 261120  }
  0x6e   : > { %s305_s7 = scalar_lea.vmem %s1298_s2, %s1205_s8  ;;  %312 = vst.msk [vmem:[#allocation2] sm:$0xff] (!%p606_p8), %vm311_vm0, %v310_v0 }
  0x74 PF: > { %vm314_vm1 = vcmask 261120   ;;  %v337_v8 = vld [vmem:[%s268_s13] sm:$0xff]  ;;  %v338_v9 = vld [vmem:[%s268_s13 + $0x8] sm:$0xff]  ;;  %v339_v10 = vld [vmem:[%s268_s13 + $0x10] sm:$0xff]  ;;  %v951_v11 = vmov 0.0|0.0   ;;  %vm952_vm2 = vmmov 0  }
  0x75   : > { %v313_v1 = vld [vmem:[#allocation2] sm:$0xff]  ;;  %633 = vmatprep.subr.bf16.mxu0 %v951_v11  ;;  %v634_v12 = vpack.c.bf16 %v338_v9, %v337_v8  ;;  %v340_v13 = vld [vmem:[%s268_s13 + $0x18] sm:$0xff]  ;;  %v953_v14 = vmov 0.0   ;;  %p609_p13 = scmp.ne.s32.totalorder %s929_s24, 1 }
  0x76   : > { %v315_v2 = vsel %vm314_vm1, %v313_v1, 0.0  ;;  %630 = vmatprep.mubr.msk.f32.mxu0 %vm952_vm2, %v953_v14  ;;  %v637_v15 = vpack.c.bf16 %v340_v13, %v339_v10  ;;  %v608_v27 = vld [vmem:[%s305_s7] ss:$0 sm:$0xff] }
  0x77   : > { %316 = vadd.xlane.f32.xlu0 %v315_v2  ;;  %635 = vmatpush3.bf16.msra.mxu0 %v634_v12  ;;  %v610_v47 = vld [vmem:[%s1299_s3] ss:$0 sm:$0xff] (!%p609_p13) }
  0x78   : > { %636 = vmatprep.subr.bf16.mxu0 %v951_v11  ;;  %v611_v49 = vld [vmem:[%s1300_s4] ss:$0 sm:$0xff] (!%p609_p13) }
  0x7b   : > { %638 = vmatpush3.bf16.msra.mxu0 %v637_v15 }
 0x104   : > { %v317_v3 = vpop.xlane.xlu0 %316 }
 0x105   : > { %v319_v4 = vmul.f32 0.03125, %v317_v3 }
 0x107   : > { %v320_v5 = vsub.f32 %v313_v1, %v319_v4 }
 0x109   : > { %v321_v6 = vmul.f32 %v320_v5, %v320_v5 }
 0x10b   : > { %v322_v7 = vsel %vm314_vm1, %v321_v6, 0.0 }
 0x10c   : > { %323 = vadd.xlane.f32.xlu0 %v322_v7 }
 0x199   : > { %v324_v16 = vpop.xlane.xlu0 %323 }
 0x19a   : > { %v326_v17 = vmul.f32 0.032258064, %v324_v16 }
 0x19c   : > { %751 = vrsqrt.f32 %v326_v17  ;;  %vm329_vm3 = vcmp.eq.f32.partialorder %v326_v17, inf  ;;  %v332_v20 = vand.u32 2147483648, %v326_v17  ;;  %vm331_vm4 = vcmp.eq.f32.partialorder %v326_v17, 0.0 }
 0x1a6   : > { %v752_v18 = vpop.eup %751 }
 0x1a7   : > { %v328_v19 = vmul.f32 %v752_v18, %v326_v17 }
 0x1a9   : > { %v330_v21 = vsel %vm329_vm3, %v326_v17, %v328_v19 }
 0x1aa   : > { %v333_v22 = vsel %vm331_vm4, %v332_v20, %v330_v21 }
 0x1ab   : > { %v334_v23 = vadd.f32 1e-06, %v333_v22 }
 0x1ad   : > { %753 = vrcp.f32 %v334_v23 }
 0x1b7   : > { %v754_v24 = vpop.eup %753 }
 0x1b8   : > { %v336_v25 = vmul.f32 %v754_v24, %v320_v5 }
 0x1ba   : > { %631 = vmatmul.mubr.msk.f32.vlgmr.msra.gmra.mrb[0].mxu0 %vm314_vm1, %v336_v25 }
 0x28c   : > { %427 = sbr.rel (%p609_p13) target bundleno = 995 (0x3e3), region = 56 }
 0x28d   : > { %v410_v26 = vpop.f32.mrb[0].mxu0 }
 0x28e   : > { %v414_v28 = vadd.f32 %v410_v26, %v313_v1  ;;  %v632_v29 = vpop.f32.mrb[1].mxu0 }
 0x290   : > { %v422_v30 = vadd.f32 %v608_v27, %v414_v28 }
 0x292   : > { %423 = vst.msk [vmem:[#allocation2] sm:$0xff] %vm314_vm1, %v422_v30 }
 0x299   : > { %v428_v31 = vld [vmem:[#allocation2] sm:$0xff] }
 0x29a   : > { %v429_v32 = vsel %vm314_vm1, %v428_v31, 0.0 }
 0x29b   : > { %430 = vadd.xlane.f32.xlu0 %v429_v32 }
 0x328   : > { %v431_v33 = vpop.xlane.xlu0 %430 }
 0x329   : > { %v432_v34 = vmul.f32 0.03125, %v431_v33 }
 0x32b   : > { %v433_v35 = vsub.f32 %v428_v31, %v432_v34 }
 0x32d   : > { %v434_v36 = vmul.f32 %v433_v35, %v433_v35 }
 0x32f   : > { %v435_v37 = vsel %vm314_vm1, %v434_v36, 0.0 }
 0x330   : > { %436 = vadd.xlane.f32.xlu0 %v435_v37 }
 0x3bd   : > { %v437_v38 = vpop.xlane.xlu0 %436 }
 0x3be   : > { %v438_v39 = vmul.f32 0.032258064, %v437_v38 }
 0x3c0   : > { %755 = vrsqrt.f32 %v438_v39  ;;  %vm441_vm5 = vcmp.eq.f32.partialorder %v438_v39, inf  ;;  %v444_v42 = vand.u32 2147483648, %v438_v39  ;;  %vm443_vm6 = vcmp.eq.f32.partialorder %v438_v39, 0.0 }
 0x3ca   : > { %v756_v40 = vpop.eup %755 }
 0x3cb   : > { %v440_v41 = vmul.f32 %v756_v40, %v438_v39 }
 0x3cd   : > { %v442_v43 = vsel %vm441_vm5, %v438_v39, %v440_v41 }
 0x3ce   : > { %v445_v44 = vsel %vm443_vm6, %v444_v42, %v442_v43 }
 0x3cf   : > { %v446_v45 = vadd.f32 1e-06, %v445_v44 }
 0x3d1   : > { %757 = vrcp.f32 %v446_v45 }
 0x3db   : > { %v758_v46 = vpop.eup %757 }
 0x3dc   : > { %v449_v48 = vmul.f32 %v758_v46, %v433_v35 }
 0x3de   : > { %v456_v50 = vmul.f32 %v610_v47, %v449_v48 }
 0x3e0   : > { %v464_v51 = vadd.f32 %v611_v49, %v456_v50 }
 0x3e2   : > { %465 = vst.msk [vmem:[%s1211_s16] sm:$0xff] %vm314_vm1, %v464_v51 }
 0x3e3 PF: > { %s613_s6 = sshll.u32 %s933_s25, 7  ;;  %s480_s13 = sshll.u32 %s1211_s16, 4  ;;  %s481_s13 = int_to_ptr.vmem [resolvable:$true] %s480_s13 }
 0x3e4   : > { %s1238_s30 = scalar_lea.hbm %s1301_s5, %s613_s6  ;;  %s467_s8 = scalar_lea.sflag [#allocation5], %s1190_s18 }
 0x3e5   : > { %s819_s10 = scalar_lea.vmem %s481_s13, 128  ;;  %p1334_p0 = scmp.ne.s32.totalorder %s1320_s12, 0 }
 0x3e6   : > { %p820_p10 = scmp.ne.s32.totalorder %s481_s13, %s819_s10  ;;  %s954_s9 = smov [#allocation8]  }
 0x3e7   : > { %s823_s7 = sshll.u32 %s954_s9, 4  ;;  %s824_s7 = int_to_ptr.vmem [resolvable:$false] %s823_s7 }
 0x3e8   : > { %p821_p7 = pnand %p820_p10, %p1334_p0  ;;  %s825_s11 = scalar_lea.vmem %s824_s7, 256 }
 0x3e9   : > { %p826_p1 = scmp.lt.s32.totalorder %s481_s13, %s824_s7  ;;  %p827_p4 = scmp.lt.s32.totalorder %s825_s11, %s819_s10 }
 0x3ea   : > { %p822_p9 = pneg %p821_p7 }
 0x3eb   : > { %p828_p11 = por %p827_p4, %p826_p1 }
 0x3ed   : > { %p829_p3 = pnand %p828_p11, %p822_p9 }
 0x3ef   : > { %832 = shalt.err (!%p829_p3)
}
 0x3f0   : > { %s833_s25 = scalar_lea.hbm %s1238_s30, 128  ;;  %s837_s29 = scalar_lea.hbm %s1301_s5, 256 }
 0x3f1   : > { %p834_p12 = scmp.ne.s32.totalorder %s1238_s30, %s833_s25  ;;  %p838_p6 = scmp.lt.u32.totalorder %s1238_s30, %s1301_s5 }
 0x3f2   : > { %p839_p8 = scmp.lt.u32.totalorder %s837_s29, %s833_s25  ;;  %p841_p10 = scmp.lt.u32.totalorder %s833_s25, %s1238_s30 }
 0x3f3   : > { %p835_p5 = pnand %p834_p12, %p1334_p0 }
 0x3f4   : > { %p840_p13 = por %p839_p8, %p838_p6 }
 0x3f5   : > { %p836_p2 = pneg %p835_p5 }
 0x3f6   : > { %p842_p7 = por %p841_p10, %p840_p13 }
 0x3f8   : > { %p843_p9 = pnand %p842_p7, %p836_p2 }
 0x3fa   : > { %846 = shalt.err (!%p843_p9)
}
 0x3fb   : > { %643 = dma.vmem_to_hbm [thread:$0]  (%p1334_p0), %s481_s13, 128, %s1238_s30, %s467_s8  }
 0x3fc PF: > { %s1335_s14 = sld [smem:[#allocation14_spill]]  ;;  %s1336_s15 = sld [smem:[#allocation12_spill]] }
 0x3fd   : > { %s1337_s6 = sld [smem:[#allocation15_spill]] }
 0x402   : > { %p657_p1 = scmp.ge.s32.totalorder %s1335_s14, 2  ;;  %s492_s21 = sand.u32 1, %s1336_s15  }
 0x403   : > { %p1338_p4 = scmp.ne.s32.totalorder %s1337_s6, 0  ;;  %s493_s17 = scalar_lea.sflag [#allocation5], %s492_s21 }
 0x405   : > { %p653_p11 = pnand %p657_p1, %p1338_p4 }
 0x407   : > { %900 = dma.done.wait (!%p653_p11), %s493_s17, 128  }
 0x408   : > { %902 = vsyncadd (!%p653_p11), %s493_s17, 4294967168  ;;  %s24_s10 = sadd.s32 1, %s1335_s14   ;;  %s1339_s24 = sld [smem:[#allocation13_spill]] }
 0x409   : > { %p21_p3 = scmp.ge.s32.totalorder %s24_s10, 6   ;;  %s1340_s12 = sld [smem:[#allocation16_spill]] }
 0x40a   : > { %s1341_s30 = sld [smem:[#allocation17_spill]]  ;;  %s1342_s18 = smov %s909_s19 }
 0x40b   : > { %s1343_s19 = smov %s913_s20  ;;  %s1344_s20 = smov %s1148_s28 }
 0x40c   : > { %s1345_s21 = smov %s921_s22  ;;  %s1346_s22 = smov %s925_s23 }
 0x40d   : > { %s1347_s23 = smov %s1157_s26  ;;  %s1348_s25 = smov %s941_s27 }
 0x40e   : > { %s1351_s28 = smov %s24_s10  ;;  %23 = sbr.rel (!%p21_p3) target bundleno = 13 (0xd), region = 109 }
 0x40f   : > { %s1349_s26 = smov %s1340_s12 }
 0x410   : > { %s1350_s27 = smov %s1341_s30 }
 0x415   :  { %498 = vsyncpa [#allocation4], 1 }
 0x416   :  { %500 = vsyncpa [#allocation4 + $0x1], 1 }
 0x417   :  { %501 = vsyncpa [#allocation7], 1 }
 0x418   :  { %503 = vsyncpa [#allocation7 + $0x1], 1 }
 0x419   :  { %504 = vsyncpa [#allocation5], 1 }
 0x41a   :  { %506 = vsyncpa [#allocation5 + $0x1], 1 }

</bundles_post_ra>
